<compile_context>
chip_gen: v5e
topology: v5e:2x2
jax: 0.10.0
libtpu: 0.0.40
codegen_flags: <defaults>
</compile_context>

<pallas_src>
import functools

import jax
import jax.numpy as jnp
from jax.experimental import pallas as pl
from jax.experimental.pallas import tpu as pltpu

_F32 = jnp.float32


# --------------------------------------------------------------------------- #
# Kernel 1: fused QKV projection (one resident weight, full-width contraction) #
# --------------------------------------------------------------------------- #
def qkv_proj_kernel(x_ref, w_ref, b_ref, o_ref, *, dq, scale):
    x = x_ref[0]                                          # (tp, d)      compute dtype
    w = w_ref[...]                                        # (d, Dtot)    compute dtype
    out = jnp.dot(x, w, preferred_element_type=_F32) + b_ref[...]        # f32
    # Fold the 1/sqrt(d_k) query scale into the Q columns (applied in f32, matching
    # the PyTorch ordering: scale before any downcast of q).
    col = jax.lax.broadcasted_iota(jnp.int32, (1, out.shape[-1]), 1)
    out = out * jnp.where(col < dq, _F32(scale), _F32(1.0))
    o_ref[0] = out.astype(o_ref.dtype)


# --------------------------------------------------------------------------- #
# Kernel 2: flash attention, grid = (B, q-tile, k-chunk)                       #
# --------------------------------------------------------------------------- #
def flash_attn_kernel(q_ref, k_ref, v_ref, o_ref, m_sc, l_sc, acc_sc,
                      *, tq, tk, causal_mask, compute_dtype):
    cd = compute_dtype
    exact_div = jnp.dtype(compute_dtype) == jnp.dtype(jnp.float32)

    kc = pl.program_id(2)
    n_k = pl.num_programs(2)
    q_start = pl.program_id(1) * tq
    k_start = kc * tk

    @pl.when(kc == 0)
    def _init():
        m_sc[...] = jnp.full(m_sc.shape, -jnp.inf, _F32)
        l_sc[...] = jnp.zeros(l_sc.shape, _F32)
        acc_sc[...] = jnp.zeros(acc_sc.shape, _F32)

    def flash_step(apply_mask):
        def body():
            qb = q_ref[0]                                 # (H, tq, d_k)
            kb = k_ref[0]                                 # (H, tk, d_k)
            vb = v_ref[0]                                 # (H, tk, d_h)
            s = jnp.einsum("hqc,hkc->hqk", qb, kb,
                           preferred_element_type=_F32)   # (H, tq, tk) f32
            if apply_mask:
                row = q_start + jax.lax.broadcasted_iota(jnp.int32, (tq, tk), 0)
                col = k_start + jax.lax.broadcasted_iota(jnp.int32, (tq, tk), 1)
                s = jnp.where((row >= col)[None, :, :], s, _F32(-1e30))
            m_prev = m_sc[...]
            m_new = jnp.maximum(m_prev, s.max(axis=-1, keepdims=True))
            alpha = jnp.exp(m_prev - m_new)
            p = jnp.exp(s - m_new)
            l_sc[...] = alpha * l_sc[...] + p.sum(axis=-1, keepdims=True)
            acc_sc[...] = alpha * acc_sc[...] + jnp.einsum(
                "hqk,hkd->hqd", p.astype(cd), vb, preferred_element_type=_F32)
            m_sc[...] = m_new
        return body

    if causal_mask:
        q_last = q_start + tq - 1
        k_last = k_start + tk - 1
        # chunk fully at/below the diagonal: no mask needed
        pl.when(k_last <= q_start)(flash_step(apply_mask=False))
        # chunk straddling the diagonal: apply mask
        pl.when(jnp.logical_and(k_last > q_start, k_start <= q_last))(
            flash_step(apply_mask=True))
        # chunks fully above the diagonal (k_start > q_last): compute skipped entirely
    else:
        flash_step(apply_mask=False)()

    @pl.when(kc == n_k - 1)
    def _finalize():
        if exact_div:
            out = acc_sc[...] / l_sc[...]
        else:
            out = acc_sc[...] * pl.reciprocal(l_sc[...], approx=True)
        o_ref[0] = out.astype(o_ref.dtype)


# --------------------------------------------------------------------------- #
# Kernel 3: output projection + residual + LN0 + MLP + residual + LN1          #
# --------------------------------------------------------------------------- #
def out_mlp_kernel(attn_ref, x_ref, wo_ref, bo_ref, g0_ref, be0_ref,
                   w1_ref, b1_ref, w2_ref, b2_ref, g1_ref, be1_ref, o_ref,
                   *, compute_dtype, eps=1e-5):
    cd = compute_dtype
    attn = attn_ref[0]                                    # (tp, Dv) compute dtype
    x = x_ref[0]                                          # (tp, d)  f32

    attn_out = jnp.dot(attn, wo_ref[...], preferred_element_type=_F32) + bo_ref[...]

    # dropout_0: identity (eval mode); residual
    x1 = attn_out + x

    def layer_norm(z, g, b):
        # fused first/second moments: one elementwise pass, two independent reductions
        mu = jnp.mean(z, axis=-1, keepdims=True)
        ms = jnp.mean(z * z, axis=-1, keepdims=True)
        var = ms - mu * mu
        return (z - mu) * jax.lax.rsqrt(var + _F32(eps)) * g + b

    x1n = layer_norm(x1, g0_ref[...], be0_ref[...])

    h = jnp.dot(x1n.astype(cd), w1_ref[...], preferred_element_type=_F32) + b1_ref[...]
    h = jnp.maximum(h, 0.0)
    y = jnp.dot(h.astype(cd), w2_ref[...], preferred_element_type=_F32) + b2_ref[...]

    # dropout_1: identity (eval mode); residual
    x2 = y + x1n
    o_ref[0] = layer_norm(x2, g1_ref[...], be1_ref[...]).astype(o_ref.dtype)


# --------------------------------------------------------------------------- #
# Wrapper                                                                      #
# --------------------------------------------------------------------------- #
def _vmem_limit_bytes():
    """Per-generation VMEM cap (capacity minus headroom); never exceeds physical VMEM."""
    try:
        cap = int(pltpu.get_tpu_info().vmem_capacity_bytes)
    except Exception:  # info unavailable -> conservative (v7x per-TensorCore VMEM)
        cap = 64 * 1024 * 1024
    if cap <= 0:
        cap = 64 * 1024 * 1024
    return max(16 * 1024 * 1024, cap - 8 * 1024 * 1024)


def _invariant_spec(p):
    """BlockSpec for a grid-invariant parameter on a 2-D grid."""
    nd = p.ndim
    return pl.BlockSpec(p.shape, lambda b, i: (0,) * nd)


def transformer_layer(x, params, *, nbr_heads, d_k, d_h, causal_mask=True,
                      q_tile=256, k_tile=512, row_tile=256,
                      compute_dtype=jnp.bfloat16):
    """x: (B, S, d) float32.  params: dict from init_params (f32, torch layout)."""
    B, S, d = x.shape
    H = nbr_heads
    Dq = H * d_k
    Dk = H * d_k
    Dv = H * d_h
    Dtot = Dq + Dk + Dv
    cd = jnp.dtype(compute_dtype)

    tq = min(q_tile, S)
    tk = min(k_tile, S)
    tp = min(row_tile, S)
    for name, t in (("q_tile", tq), ("k_tile", tk), ("row_tile", tp)):
        if S % t:
            raise ValueError(f"S={S} must be divisible by {name}={t}")

    vmem_limit = _vmem_limit_bytes()
    cp2 = pltpu.CompilerParams(dimension_semantics=("parallel", "parallel"),
                               vmem_limit_bytes=vmem_limit)
    cp3 = pltpu.CompilerParams(
        dimension_semantics=("parallel", "parallel", "arbitrary"),
        vmem_limit_bytes=vmem_limit)

    # ---- pass 1: fused QKV projection (computed once; K/V never recomputed) ----
    w_qkv = jnp.concatenate([params["wq"], params["wk"], params["wv"]], axis=1).astype(cd)
    b_qkv = jnp.concatenate([params["bq"], params["bk"], params["bv"]], axis=1).astype(_F32)
    x_cd = x.astype(cd)   # halve the activation HBM read on the compute path

    qkv = pl.pallas_call(
        functools.partial(qkv_proj_kernel, dq=Dq, scale=1.0 / (d_k ** 0.5)),
        out_shape=jax.ShapeDtypeStruct((B, S, Dtot), cd),
        grid_spec=pltpu.PrefetchScalarGridSpec(
            num_scalar_prefetch=0,
            grid=(B, S // tp),
            in_specs=[pl.BlockSpec((1, tp, d), lambda b, i: (b, i, 0)),
                      _invariant_spec(w_qkv),
                      _invariant_spec(b_qkv)],
            out_specs=pl.BlockSpec((1, tp, Dtot), lambda b, i: (b, i, 0)),
        ),
        compiler_params=cp2,
    )(x_cd, w_qkv, b_qkv)

    # Head split as an XLA relayout (NOT inside a kernel -> no (8,128) relayout copies).
    q = qkv[..., :Dq].reshape(B, S, H, d_k).transpose(0, 2, 1, 3)        # (B,H,S,d_k)
    k = qkv[..., Dq:Dq + Dk].reshape(B, S, H, d_k).transpose(0, 2, 1, 3)  # (B,H,S,d_k)
    v = qkv[..., Dq + Dk:].reshape(B, S, H, d_h).transpose(0, 2, 1, 3)    # (B,H,S,d_h)

    # ---- pass 2: flash attention, K/V streamed via the last ("arbitrary") grid axis ----
    attn_heads = pl.pallas_call(
        functools.partial(flash_attn_kernel, tq=tq, tk=tk,
                          causal_mask=causal_mask, compute_dtype=cd),
        out_shape=jax.ShapeDtypeStruct((B, H, S, d_h), cd),
        grid_spec=pltpu.PrefetchScalarGridSpec(
            num_scalar_prefetch=0,
            grid=(B, S // tq, S // tk),
            in_specs=[pl.BlockSpec((1, H, tq, d_k), lambda b, qi, kc: (b, 0, qi, 0)),
                      pl.BlockSpec((1, H, tk, d_k), lambda b, qi, kc: (b, 0, kc, 0)),
                      pl.BlockSpec((1, H, tk, d_h), lambda b, qi, kc: (b, 0, kc, 0))],
            out_specs=pl.BlockSpec((1, H, tq, d_h), lambda b, qi, kc: (b, 0, qi, 0)),
            scratch_shapes=[pltpu.VMEM((H, tq, 1), _F32),     # running max
                            pltpu.VMEM((H, tq, 1), _F32),     # running denom
                            pltpu.VMEM((H, tq, d_h), _F32)],  # accumulator
        ),
        compiler_params=cp3,
    )(q, k, v)

    # Head merge as an XLA relayout.
    attn_cat = attn_heads.transpose(0, 2, 1, 3).reshape(B, S, Dv)

    # ---- pass 3: output projection + residual + LN0 + MLP + residual + LN1 ----
    wo = params["wo"].astype(cd)
    bo = params["bo"].astype(_F32)
    g0 = params["g0"].astype(_F32)
    be0 = params["be0"].astype(_F32)
    w1 = params["w1"].astype(cd)
    b1 = params["b1"].astype(_F32)
    w2 = params["w2"].astype(cd)
    b2 = params["b2"].astype(_F32)
    g1 = params["g1"].astype(_F32)
    be1 = params["be1"].astype(_F32)

    out = pl.pallas_call(
        functools.partial(out_mlp_kernel, compute_dtype=cd),
        out_shape=jax.ShapeDtypeStruct((B, S, d), x.dtype),
        grid_spec=pltpu.PrefetchScalarGridSpec(
            num_scalar_prefetch=0,
            grid=(B, S // tp),
            in_specs=[pl.BlockSpec((1, tp, Dv), lambda b, i: (b, i, 0)),
                      pl.BlockSpec((1, tp, d), lambda b, i: (b, i, 0)),
                      _invariant_spec(wo), _invariant_spec(bo),
                      _invariant_spec(g0), _invariant_spec(be0),
                      _invariant_spec(w1), _invariant_spec(b1),
                      _invariant_spec(w2), _invariant_spec(b2),
                      _invariant_spec(g1), _invariant_spec(be1)],
            out_specs=pl.BlockSpec((1, tp, d), lambda b, i: (b, i, 0)),
        ),
        compiler_params=cp2,
    )(attn_cat, x, wo, bo, g0, be0, w1, b1, w2, b2, g1, be1)
    return out


# --------------------------------------------------------------------------- #
# Parameters & pure-JAX reference                                              #
# --------------------------------------------------------------------------- #
def init_params(key, d, d_k, d_h, nbr_heads, ffn_factor):
    """Deterministic synthetic parameters (shapes match the PyTorch module)."""
    ks = jax.random.split(key, 16)
    dk_total = nbr_heads * d_k
    dh_total = nbr_heads * d_h
    d_ffn = d * ffn_factor

    def w(k, shape, fan_in):
        return jax.random.normal(k, shape, _F32) / jnp.sqrt(_F32(fan_in))

    def b(k, shape):
        return 0.1 * jax.random.normal(k, shape, _F32)

    return {
        # attention projections stored as (in, out); PyTorch Linear computes x @ W.T
        "wq": w(ks[0], (d, dk_total), d), "bq": b(ks[1], (1, dk_total)),
        "wk": w(ks[2], (d, dk_total), d), "bk": b(ks[3], (1, dk_total)),
        "wv": w(ks[4], (d, dh_total), d), "bv": b(ks[5], (1, dh_total)),
        "wo": w(ks[6], (dh_total, d), dh_total), "bo": b(ks[7], (1, d)),
        "g0": 1.0 + 0.1 * jax.random.normal(ks[8], (1, d), _F32), "be0": b(ks[9], (1, d)),
        "w1": w(ks[10], (d, d_ffn), d), "b1": b(ks[11], (1, d_ffn)),
        "w2": w(ks[12], (d_ffn, d), d_ffn), "b2": b(ks[13], (1, d)),
        "g1": 1.0 + 0.1 * jax.random.normal(ks[14], (1, d), _F32), "be1": b(ks[15], (1, d)),
    }


def transformer_layer_ref(x, p, *, nbr_heads, d_k, d_h, causal_mask=True,
                          compute_dtype=jnp.float32):
    """Pure-JAX reference.  compute_dtype mirrors the kernel's MXU operand dtype
    (float32 == exact PyTorch/eval semantics)."""
    cd = compute_dtype
    B, S, d = x.shape

    def mm(a, w):
        return jnp.dot(a.astype(cd), w.astype(cd), preferred_element_type=_F32)

    q = (mm(x, p["wq"]) + p["bq"]) * (1.0 / jnp.sqrt(_F32(d_k)))
    k = mm(x, p["wk"]) + p["bk"]
    v = mm(x, p["wv"]) + p["bv"]
    q = q.reshape(B, S, nbr_heads, d_k).transpose(0, 2, 1, 3)
    k = k.reshape(B, S, nbr_heads, d_k).transpose(0, 2, 1, 3)
    v = v.reshape(B, S, nbr_heads, d_h).transpose(0, 2, 1, 3)
    s = jnp.einsum("bhqc,bhkc->bhqk", q.astype(cd), k.astype(cd),
                   preferred_element_type=_F32)
    if causal_mask:
        row = jnp.arange(S)[:, None]
        col = jnp.arange(S)[None, :]
        s = jnp.where(row >= col, s, -1e30)
    m = s.max(-1, keepdims=True)
    e = jnp.exp(s - m)
    l = e.sum(-1, keepdims=True)
    o = jnp.einsum("bhqk,bhkd->bhqd", e.astype(cd), v.astype(cd),
                   preferred_element_type=_F32) / l
    o = o.transpose(0, 2, 1, 3).reshape(B, S, nbr_heads * d_h)
    attn = mm(o, p["wo"]) + p["bo"]

    def ln(z, g, b):
        mu = z.mean(-1, keepdims=True)
        var = ((z - mu) ** 2).mean(-1, keepdims=True)
        return (z - mu) * jax.lax.rsqrt(var + 1e-5) * g + b

    x1 = ln(attn + x, p["g0"], p["be0"])
    h = jnp.maximum(mm(x1, p["w1"]) + p["b1"], 0.0)
    y = mm(h, p["w2"]) + p["b2"]
    return ln(y + x1, p["g1"], p["be1"])


# --------------------------------------------------------------------------- #
# Self-test                                                                    #
# --------------------------------------------------------------------------- #
if __name__ == "__main__":
    key = jax.random.PRNGKey(0)

    def check(B, S, d, d_k, d_h, H, ffn, tiles, tag):
        kx, kp = jax.random.split(jax.random.fold_in(key, hash(tag) & 0xFFFF))
        x = jax.random.normal(kx, (B, S, d), jnp.float32)
        params = init_params(kp, d, d_k, d_h, H, ffn)
        common = dict(nbr_heads=H, d_k=d_k, d_h=d_h, causal_mask=True, **tiles)

        # f32 MXU operands: tight check against module-semantics reference.
        out_f32 = jax.block_until_ready(
            transformer_layer(x, params, compute_dtype=jnp.float32, **common))
        ref_f32 = transformer_layer_ref(x, params, nbr_heads=H, d_k=d_k, d_h=d_h,
                                        causal_mask=True, compute_dtype=jnp.float32)
        assert out_f32.shape == (B, S, d)
        assert jnp.allclose(out_f32, ref_f32, atol=5e-3, rtol=5e-3), f"{tag}: f32 mismatch"

        # bf16 MXU operands (default fast path): precision-matched reference.
        out_bf16 = jax.block_until_ready(
            transformer_layer(x, params, compute_dtype=jnp.bfloat16, **common))
        ref_bf16 = transformer_layer_ref(x, params, nbr_heads=H, d_k=d_k, d_h=d_h,
                                         causal_mask=True, compute_dtype=jnp.bfloat16)
        assert out_bf16.shape == (B, S, d)
        assert jnp.allclose(out_bf16, ref_bf16, atol=3e-2, rtol=3e-2), f"{tag}: bf16 mismatch"

    # Config A: small, module-consistent shapes (single tile / single K chunk).
    check(B=2, S=8, d=32, d_k=8, d_h=8, H=4, ffn=4,
          tiles=dict(q_tile=8, k_tile=8, row_tile=8), tag="small")

    # Config B: multi-q-tile / multi-K-chunk — exercises the online softmax across
    # chunks, the causal compute-skip, and the diagonal-only masking.
    check(B=2, S=256, d=64, d_k=16, d_h=16, H=4, ffn=4,
          tiles=dict(q_tile=128, k_tile=64, row_tile=128), tag="multi_chunk")

    print("KERNEL_OK")
</pallas_src>

<mosaic_0001>
module attributes {stable_mosaic.version = 11 : i64} {
  func.func @qkv_proj_kernel(%arg0: i32, %arg1: i32, %arg2: memref<1x8x32xf32, #tpu.memory_space<vmem>>, %arg3: memref<32x96xf32, #tpu.memory_space<vmem>>, %arg4: memref<1x96xf32, #tpu.memory_space<vmem>>, %arg5: memref<1x8x96xf32, #tpu.memory_space<vmem>>) attributes {dimension_semantics = [#tpu.dimension_semantics<parallel>, #tpu.dimension_semantics<parallel>], iteration_bounds = array<i64: 2, 1>, scalar_prefetch = 0 : i64, scratch_operands = 0 : i64, tpu.core_type = #tpu.core_type<tc>, window_params = [{transform_indices = @transform_0, window_bounds = array<i64: 1, 8, 32>}, {pipeline_mode = #tpu.pipeline_mode<synchronous>, transform_indices = @transform_1, window_bounds = array<i64: 32, 96>}, {pipeline_mode = #tpu.pipeline_mode<synchronous>, transform_indices = @transform_2, window_bounds = array<i64: 1, 96>}, {transform_indices = @transform_3, window_bounds = array<i64: 1, 8, 96>}]} {
    %c0 = arith.constant 0 : index
    %c0_0 = arith.constant 0 : index
    %c0_1 = arith.constant 0 : index
    %0 = vector.load %arg2[%c0, %c0_0, %c0_1] : memref<1x8x32xf32, #tpu.memory_space<vmem>>, vector<1x8x32xf32>
    %1 = vector.shape_cast %0 : vector<1x8x32xf32> to vector<8x32xf32>
    %c0_2 = arith.constant 0 : index
    %c0_3 = arith.constant 0 : index
    %2 = vector.load %arg3[%c0_2, %c0_3] : memref<32x96xf32, #tpu.memory_space<vmem>>, vector<32x96xf32>
    %cst = arith.constant dense<0.000000e+00> : vector<8x96xf32>
    %3 = tpu.matmul %1, %2, %cst {dimension_numbers = #tpu.dot_dimension_numbers<[1], [0], [0], [1], [0, 0, 1, 1], [], []>} : vector<8x32xf32>, vector<32x96xf32>, vector<8x96xf32> -> vector<8x96xf32>
    %c0_4 = arith.constant 0 : index
    %c0_5 = arith.constant 0 : index
    %4 = vector.load %arg4[%c0_4, %c0_5] : memref<1x96xf32, #tpu.memory_space<vmem>>, vector<1x96xf32>
    %5 = vector.broadcast %4 : vector<1x96xf32> to vector<8x96xf32>
    %6 = arith.addf %3, %5 : vector<8x96xf32>
    %7 = tpu.iota {dimensions = array<i32: 1>} : vector<1x96xi32>
    %c32_i32 = arith.constant 32 : i32
    %8 = vector.broadcast %c32_i32 : i32 to vector<1x96xi32>
    %9 = arith.cmpi slt, %7, %8 : vector<1x96xi32>
    %cst_6 = arith.constant 0.353553385 : f32
    %cst_7 = arith.constant 1.000000e+00 : f32
    %10 = vector.broadcast %cst_6 : f32 to vector<1x96xf32>
    %11 = vector.broadcast %cst_7 : f32 to vector<1x96xf32>
    %12 = arith.select %9, %10, %11 : vector<1x96xi1>, vector<1x96xf32>
    %13 = vector.broadcast %12 : vector<1x96xf32> to vector<8x96xf32>
    %14 = arith.mulf %6, %13 : vector<8x96xf32>
    %c0_8 = arith.constant 0 : index
    %c0_9 = arith.constant 0 : index
    %c0_10 = arith.constant 0 : index
    %15 = vector.load %arg5[%c0_8, %c0_9, %c0_10] : memref<1x8x96xf32, #tpu.memory_space<vmem>>, vector<1x8x96xf32>
    %16 = vector.shape_cast %15 : vector<1x8x96xf32> to vector<8x96xf32>
    %17 = vector.shape_cast %14 : vector<8x96xf32> to vector<1x8x96xf32>
    tpu.vector_store %arg5[%c0_8, %c0_9, %c0_10], %17 {strides = array<i32>} : memref<1x8x96xf32, #tpu.memory_space<vmem>>, vector<1x8x96xf32>,
    return
  }
  func.func @transform_0(%arg0: i32, %arg1: i32) -> (i32, i32, i32) {
    %c0_i32 = arith.constant 0 : i32
    %c0_i32_0 = arith.constant 0 : i32
    return %arg0, %arg1, %c0_i32 : i32, i32, i32
  }
  func.func @transform_1(%arg0: i32, %arg1: i32) -> (i32, i32) {
    %c0_i32 = arith.constant 0 : i32
    %c0_i32_0 = arith.constant 0 : i32
    %c0_i32_1 = arith.constant 0 : i32
    return %c0_i32, %c0_i32_0 : i32, i32
  }
  func.func @transform_2(%arg0: i32, %arg1: i32) -> (i32, i32) {
    %c0_i32 = arith.constant 0 : i32
    %c0_i32_0 = arith.constant 0 : i32
    %c0_i32_1 = arith.constant 0 : i32
    return %c0_i32, %c0_i32_0 : i32, i32
  }
  func.func @transform_3(%arg0: i32, %arg1: i32) -> (i32, i32, i32) {
    %c0_i32 = arith.constant 0 : i32
    %c0_i32_0 = arith.constant 0 : i32
    return %arg0, %arg1, %c0_i32 : i32, i32, i32
  }
}

</mosaic_0001>

<bundles_post_ra>
// kernel: tpu_custom_call.1
= control target key start
LH: loop header
LB: loop body
LE: loop exit
PB: predicated region body
PF: predicated region fallthrough
CT: control target
= control target key end

     0   :  { %8 = vsyncpa [#allocation3], 0  ;;  %s780_s0 = inlined_call_operand.hbm [shape: f32[2,8,32], index: 0, kind: input, shape index: {}]   ;;  %s781_s1 = inlined_call_operand.hbm [shape: f32[32,96], index: 1, kind: input, shape index: {}]   ;;  %s782_s2 = inlined_call_operand.vmem [shape: f32[1,96], index: 2, kind: input, shape index: {}]   ;;  %s783_s3 = inlined_call_operand.hbm [shape: f32[2,8,96], index: 3, kind: output, shape index: {}]  }
   0x1   :  { %10 = vsyncpa [#allocation3 + $0x1], 0 }
   0x2   :  { %11 = vsyncpa [#allocation6], 0 }
   0x3   :  { %12 = vsyncpa [#allocation4], 0 }
   0x4   :  { %14 = vsyncpa [#allocation4 + $0x1], 0  ;;  %s634_s12 = smov 0   ;;  %s636_s13 = smov 0  }
   0x5   :  { %s638_s14 = smov 0   ;;  %s640_s15 = smov 0  }
   0x6   :  { %s642_s16 = smov 0   ;;  %s644_s17 = smov 0  }
   0x7 LB: > { %s369_s18 = sadd.s32 4294967295, %s608_s17   ;;  %p371_p0 = scmp.ge.s32.totalorder %s608_s17, 1  ;;  %s608_s17 = sphi %s644_s17, %s20_s17   ;;  %s604_s16 = sphi %s642_s16, %s794_s16   ;;  %s600_s15 = sphi %s640_s15, %s793_s15   ;;  %s596_s14 = sphi %s638_s14, %s792_s14   ;;  %s592_s13 = sphi %s636_s13, %s791_s13   ;;  %s588_s12 = sphi %s634_s12, %s790_s12  }
   0x8   : > { %p666_p1 = scmp.eq.s32.totalorder %s369_s18, 0  ;;  %p135_p2 = scmp.lt.s32.totalorder %s608_s17, 3 }
   0x9   : > { %s146_s22 = sshll.u32 %s781_s1, 4  ;;  %s610_s24 = smov [#allocation5]   ;;  %s147_s22 = int_to_ptr.hbm [resolvable:$true] %s146_s22 }
   0xa   : > { %p674_p3 = pnand %p371_p0, %p135_p2  ;;  %s148_s25 = sshll.u32 %s610_s24, 4  ;;  %s149_s25 = int_to_ptr.vmem [resolvable:$true] %s148_s25 }
   0xb   : > { %p373_p6 = scmp.ge.s32.totalorder %s608_s17, 2  ;;  %s611_s26 = smov 128  }
   0xc   : > { %p393_p4 = pneg %p674_p3  ;;  %s612_s27 = smov 8  }
   0xd   : > { %s370_s28 = sadd.s32 4294967294, %s608_s17   ;;  %s32_s29 = sadd.s32 1, %s604_s16 }
   0xe   : > { %p394_p5 = pnand %p393_p4, %p666_p1  ;;  %s41_s30 = sadd.s32 1, %s596_s14 }
   0xf   : > { %p34_p7 = scmp.ge.s32.totalorder %s32_s29, 2  ;;  %p48_p8 = scmp.ne.s32.totalorder %s596_s14, %s592_s13 }
  0x10   : > { %396 = dma.hbm_to_vmem [thread:$0]  (!%p394_p5), %s147_s22, 512, %s149_s25, [#allocation6], %s611_s26, %s611_s26, %s612_s27  }
  0x11   : > { %p49_p9 = scmp.eq.s32.totalorder %s608_s17, 0  ;;  %p54_p10 = scmp.ne.s32.totalorder %s592_s13, %s588_s12 }
  0x12   : > { %s796_s29 = smov (%p34_p7, %s32_s29), 0  ;;  %p122_p13 = scmp.eq.s32.totalorder %s369_s18, 1 }
  0x13   : > { %p693_p11 = por %p49_p9, %p48_p8  ;;  %p699_p12 = por %p666_p1, %p54_p10 }
  0x14   : > { %s36_s6 = ssub.s32 %s604_s16, %s796_s29  ;;  %p128_p2 = scmp.eq.s32.totalorder %s370_s28, 1 }
  0x15   : > { %p39_p0 = scmp.eq.s32.totalorder %s36_s6, 0  ;;  %p705_p4 = por %p122_p13, %p48_p8 }
  0x16   : > { %p406_p5 = scmp.lt.s32.totalorder %s608_s17, 2  ;;  %p713_p7 = por %p128_p2, %p54_p10 }
  0x17   : > { %s711_s8 = scalar_select %p39_p0, %s596_s14, %s41_s30  }
  0x18   : > { %s165_s10 = sand.u32 1, %s596_s14   ;;  %s375_s20 = sshll.u32 %s604_s16, 3 }
  0x19   : > { %s374_s11 = sshll.u32 %s165_s10, 3  ;;  %s174_s18 = scalar_lea.hbm %s780_s0, %s375_s20 }
  0x1a   : > { %s169_s24 = scalar_lea.vmem [#allocation2], %s374_s11  ;;  %s176_s26 = sshll.u32 %s174_s18, 4  ;;  %s177_s26 = int_to_ptr.hbm [resolvable:$true] %s176_s26 }
  0x1b   : > { %s178_s25 = sshll.u32 %s169_s24, 4  ;;  %p398_p8 = pnand %p406_p5, %p693_p11  ;;  %s179_s25 = int_to_ptr.vmem [resolvable:$true] %s178_s25 }
  0x1c   : > { %s166_s27 = scalar_lea.sflag [#allocation3], %s165_s10  ;;  %187 = sbr.rel (%p674_p3) target bundleno = 177 (0xb1), region = 32 }
  0x1d   : > { %400 = dma.hbm_to_vmem [thread:$0]  (!%p398_p8), %s177_s26, 128, %s179_s25, %s166_s27  }
  0x1e   : > { %s727_s28 = sand.u32 (!%p674_p3), 1, %s592_s13  }
  0x1f   : > { %s377_s30 = sshll.u32 (!%p674_p3), %s727_s28, 3  ;;  %s190_s6 = scalar_lea.sflag (!%p674_p3), [#allocation3], %s727_s28 }
  0x20   : > { %s193_s11 = scalar_lea.vmem (!%p674_p3), [#allocation2], %s377_s30 }
  0x21   : > { %575 = dma.done.wait (%p699_p12), %s190_s6, 128  }
  0x22   : > { %577 = vsyncadd (%p699_p12), %s190_s6, 4294967168 }
  0x23   : > { %579 = dma.done.wait (%p666_p1), [#allocation6], 512  }
  0x24   : > { %581 = vsyncadd (%p666_p1), [#allocation6], 4294966784  ;;  %v226_v0 = vld [vmem:[#allocation5 + $0x18] sm:$0xff]  ;;  %v225_v1 = vld [vmem:[#allocation5 + $0x10] sm:$0xff]  ;;  %vm231_vm0 = vcmask 261120   ;;  %v255_v5 = vlaneseq  ;;  %s382_s23 = sshll.u32 %s600_s15, 3 }
  0x25   : > { %247 = vmatpush.msra.mxu0 %v226_v0  ;;  %v224_v2 = vld [vmem:[#allocation5 + $0x8] sm:$0xff]  ;;  %v223_v3 = vld [vmem:[#allocation5] sm:$0xff]  ;;  %v222_v4 = vld [vmem:[%s193_s11] sm:$0xff]  ;;  %s274_s20 = scalar_lea.hbm %s783_s3, %s382_s23  ;;  %v613_v9 = vmov 1.0   ;;  %s221_s21 = scalar_lea.vmem [#allocation7], %s377_s30  ;;  %vm260_vm2 = vcmask 785408  }
  0x26   : > { %v256_v6 = vand.u32 127, %v255_v5  ;;  %v461_v7 = vld [vmem:[%s782_s2] ss:$0 sm:$0xff]  ;;  %s276_s22 = sshll.u32 %s221_s21, 4  ;;  %s278_s18 = sshll.u32 %s274_s20, 4  ;;  %s277_s22 = int_to_ptr.vmem [resolvable:$true] %s276_s22  ;;  %s279_s18 = int_to_ptr.hbm [resolvable:$true] %s278_s18 }
  0x27   : > { %248 = vmatpush.msra.mxu0 %v225_v1  ;;  %s263_s15 = scalar_lea.sflag [#allocation4], %s727_s28  ;;  %s536_s24 = sshra.s32 %s279_s18, 4  ;;  %s537_s24 = int_to_ptr.hbm [resolvable:$true] %s536_s24 }
  0x28   : > { %vm257_vm1 = vcmp.lt.s32.totalorder %v256_v6, 32  ;;  %s538_s25 = scalar_lea.hbm %s537_s24, 8  ;;  %s542_s30 = scalar_lea.hbm %s783_s3, 16 }
  0x29   : > { %249 = vmatpush.msra.mxu0 %v224_v2  ;;  %v258_v10 = vsel %vm257_vm1, 0.35355338, %v613_v9  ;;  %p539_p1 = scmp.ne.s32.totalorder %s537_s24, %s538_s25  ;;  %p543_p10 = scmp.lt.s32.totalorder %s537_s24, %s783_s3 }
  0x2a   : > { %p544_p11 = scmp.lt.s32.totalorder %s542_s30, %s538_s25 }
  0x2b   : > { %250 = vmatpush.msra.mxu0 %v223_v3  ;;  %p540_p3 = pnand %p539_p1, %p705_p4 }
  0x2c   : > { %380 = vmatmul.msk.f32.vlgmr.msra.gmra.mxu0 %vm231_vm0, %v222_v4  ;;  %p545_p12 = por %p544_p11, %p543_p10 }
  0x2d   : > { %p541_p9 = pneg %p540_p3 }
  0x2f   : > { %p546_p13 = pnand %p545_p12, %p541_p9 }
  0xa9   : > { %v252_v8 = vpop.f32.mrf.mxu0 }
  0xaa   : > { %v253_v11 = vadd.f32 %v461_v7, %v252_v8 }
  0xac   : > { %v259_v12 = vmul.f32 %v258_v10, %v253_v11 }
  0xae   : > { %261 = vst.msk [vmem:[%s221_s21] sm:$0xff] %vm260_vm2, %v259_v12 }
  0xaf   : > { %549 = shalt.err (!%p546_p13)
}
  0xb0   : > { %391 = dma.vmem_to_hbm [thread:$0]  (%p705_p4), %s277_s22, 128, %s279_s18, %s263_s15  }
  0xb1 PF: > { %s290_s28 = sand.u32 1, %s588_s12   ;;  %p402_p0 = pnand %p373_p6, %p713_p7 }
  0xb2   : > { %s291_s23 = scalar_lea.sflag [#allocation4], %s290_s28 }
  0xb3   : > { %p403_p2 = pneg %p402_p0 }
  0xb5   : > { %583 = dma.done.wait (%p403_p2), %s291_s23, 128  }
  0xb6   : > { %585 = vsyncadd (%p403_p2), %s291_s23, 4294967168  ;;  %s20_s17 = sadd.s32 1, %s608_s17   ;;  %s790_s12 = smov %s592_s13 }
  0xb7   : > { %p17_p5 = scmp.ge.s32.totalorder %s20_s17, 4   ;;  %s791_s13 = smov %s596_s14 }
  0xb8   : > { %s792_s14 = smov %s711_s8  ;;  %s793_s15 = smov %s604_s16 }
  0xb9   : > { %s794_s16 = smov %s796_s29  ;;  %19 = sbr.rel (!%p17_p5) target bundleno = 7 (0x7), region = 81 }
  0xbe   :  { %297 = vsyncpa [#allocation3], 1 }
  0xbf   :  { %299 = vsyncpa [#allocation3 + $0x1], 1 }
  0xc0   :  { %300 = vsyncpa [#allocation6], 1 }
  0xc1   :  { %301 = vsyncpa [#allocation4], 1 }
  0xc2   :  { %303 = vsyncpa [#allocation4 + $0x1], 1 }

</bundles_post_ra>
